<compile_context>
chip_gen: v6e
topology: v6e:2x2x1
jax: 0.10.0
libtpu: 0.0.40
codegen_flags: <defaults>
</compile_context>

<pallas_src>
import jax
import jax.numpy as jnp
from jax.experimental import pallas as pl
from jax.experimental.pallas import tpu as pltpu

_TARGET_BLOCK_BYTES = 2 << 20   # ~2 MiB of f32 logits per block
_VMEM_SOFT_BUDGET = 12 << 20    # keep double-buffered streams under v5e's 16 MiB scoped default
_PAD_LOGIT = -1.0e4             # padded rows/cols contribute exactly 0 to the focal sum


def _round_up(x, m):
    return -(-x // m) * m


def _pick_tb(batch, lp, ncores, t_itemsize, tb=None):
    """Rows per tile: byte-budgeted, multiple of 16 (bf16-safe), capped by VMEM budget."""
    if tb is None:
        tb = _TARGET_BLOCK_BYTES // (4 * lp)
    tb = min(int(tb), _VMEM_SOFT_BUDGET // (2 * (4 + t_itemsize) * lp))
    tb = max(16, (tb // 16) * 16)
    # No point exceeding one core's (padded) batch slice.
    per_core = _round_up(_round_up(batch, ncores) // ncores, 16)
    return min(tb, max(16, per_core))


def _make_focal_kernel(use_pw, nsteps, tb, gamma, approx):
    """Kernel factory: pos_weight / nsteps==1 / gamma==2 are specialized statically."""
    single = nsteps == 1

    def kernel(*refs):
        if use_pw:
            logits_ref, targets_ref, pwm1_ref, *rest = refs
        else:
            logits_ref, targets_ref, *rest = refs
            pwm1_ref = None
        out_ref = rest[0]
        acc_ref = None if single else rest[1]

        i = pl.program_id(1)  # reduction step within this core's batch slice

        x = logits_ref[...].astype(jnp.float32)   # [TB, L]
        y = targets_ref[...].astype(jnp.float32)  # [TB, L]

        # One EUP exp per element, shared by softplus(-x) and sigmoid(x).
        e = jnp.exp(-jnp.abs(x))                  # exp(-|x|) in (0, 1]
        sp = jnp.maximum(-x, 0.0) + jnp.log1p(e)  # softplus(-x), numerically stable

        # BCE-with-logits (== torch.nn.BCEWithLogitsLoss with/without pos_weight):
        #   loss = (1-y)*x + (pw*y + (1-y))*softplus(-x),  pw*y + (1-y) == 1 + (pw-1)*y
        one_m_y = 1.0 - y
        if use_pw:
            bce = one_m_y * x + (1.0 + pwm1_ref[...] * y) * sp
        else:
            bce = one_m_y * x + sp

        # sigmoid(x) from the same e:  x>=0 -> 1/(1+e),  x<0 -> e/(1+e)
        denom = 1.0 + e
        inv = pl.reciprocal(denom, approx=True) if approx else 1.0 / denom
        prob = jnp.where(x >= 0.0, inv, e * inv)

        # (1 - pt) directly: select-free focal weight, exact for soft labels too.
        om = jnp.where(y == 1.0, 1.0 - prob, prob)
        fw = om * om if gamma == 2.0 else om ** gamma   # gamma==2 -> one VPU mul
        focal = fw * bce

        # Fold TB rows down to one 8-sublane vreg row (tile-aligned reshape, VPU adds).
        if tb > 8:
            partial8 = jnp.sum(focal.reshape(tb // 8, 8, -1), axis=0)
        else:
            partial8 = focal

        if single:
            out_ref[...] = jnp.sum(partial8, axis=0).reshape(1, 1, -1)
        else:
            @pl.when(i == 0)
            def _():
                acc_ref[...] = partial8            # direct write, no zero-init pass

            @pl.when(i > 0)
            def _():
                acc_ref[...] += partial8

            @pl.when(i == nsteps - 1)
            def _():
                # Sublane reduce only; cross-lane sum + 1/n scale happen in the wrapper.
                out_ref[...] = jnp.sum(acc_ref[...], axis=0).reshape(1, 1, -1)

    return kernel


def focal_loss(logits, targets, pos_weight=None, gamma=2.0, *,
               tb=None, ncores=2, approx_reciprocal=True):
    """Pallas FocalLoss forward.  logits/targets: [B, L].  Returns scalar f32."""
    B, L = logits.shape
    assert targets.shape == (B, L)
    ncores = max(int(ncores), 1)

    lp = _round_up(L, 128)                         # lane-dense loads and output store
    t_item = jnp.dtype(targets.dtype).itemsize
    tb = _pick_tb(B, lp, ncores, t_item, tb)
    nsteps = _round_up(B, ncores * tb) // (ncores * tb)
    bp = ncores * nsteps * tb

    # Pad ragged B / L: padded elements contribute exactly 0 (see _PAD_LOGIT note).
    if (bp, lp) != (B, L):
        logits = jnp.pad(logits, ((0, bp - B), (0, lp - L)), constant_values=_PAD_LOGIT)
        targets = jnp.pad(targets, ((0, bp - B), (0, lp - L)))

    use_pw = pos_weight is not None

    def xy_map(c, i):
        return (c * nsteps + i, 0)

    in_specs = [
        pl.BlockSpec((tb, lp), xy_map),            # logits
        pl.BlockSpec((tb, lp), xy_map),            # targets (any dtype; cast in-kernel)
    ]
    args = [logits, targets]
    if use_pw:
        pwm1 = jnp.asarray(pos_weight, jnp.float32).reshape(1, L) - 1.0
        if lp != L:
            pwm1 = jnp.pad(pwm1, ((0, 0), (0, lp - L)))
        in_specs.append(pl.BlockSpec((1, lp), lambda c, i: (0, 0)))
        args.append(pwm1)

    scratch = [] if nsteps == 1 else [pltpu.VMEM((8, lp), jnp.float32)]

    partials = pl.pallas_call(
        _make_focal_kernel(use_pw, nsteps, tb, float(gamma), approx_reciprocal),
        out_shape=jax.ShapeDtypeStruct((ncores, 1, lp), jnp.float32),
        grid=(ncores, nsteps),
        in_specs=in_specs,
        out_specs=pl.BlockSpec((1, 1, lp), lambda c, i: (c, 0, 0)),
        scratch_shapes=scratch,
        compiler_params=pltpu.CompilerParams(
            dimension_semantics=("parallel", "arbitrary"),
        ),
    )(*args)

    # Final cross-lane / cross-core reduce + mean scaling by the TRUE element count.
    return jnp.sum(partials) * (1.0 / float(B * L))


def focal_loss_ref(logits, targets, pos_weight=None, gamma=2.0):
    """Pure-JAX reference (mirrors the PyTorch module) for sanity checking."""
    x = logits.astype(jnp.float32)
    y = targets.astype(jnp.float32)
    sp = jnp.maximum(-x, 0.0) + jnp.log1p(jnp.exp(-jnp.abs(x)))
    if pos_weight is None:
        bce = (1.0 - y) * x + sp
    else:
        pw = jnp.asarray(pos_weight, dtype=jnp.float32).reshape(1, -1)
        bce = (1.0 - y) * x + (pw * y + (1.0 - y)) * sp
    prob = jax.nn.sigmoid(x)
    pt = jnp.where(y == 1.0, prob, 1.0 - prob)
    focal = (1.0 - pt) ** gamma * bce
    return jnp.mean(focal)


if __name__ == "__main__":
    key = jax.random.PRNGKey(0)
    k1, k2, k3 = jax.random.split(key, 3)

    B, L = 64, 128  # batch x num_labels (multi-label logits)
    logits = jax.random.normal(k1, (B, L), dtype=jnp.float32) * 2.0
    targets_f32 = (jax.random.uniform(k2, (B, L)) > 0.5).astype(jnp.float32)
    targets = targets_f32.astype(jnp.bfloat16)   # hard 0/1 labels: exact in bf16
    pos_weight = 0.5 + jax.random.uniform(k3, (L,), dtype=jnp.float32)

    ref_pw = focal_loss_ref(logits, targets_f32, pos_weight)
    ref_nopw = focal_loss_ref(logits, targets_f32, None)

    # 1) pos_weight path, auto tiling, exact reciprocal -> tight tolerance.
    out1 = jax.block_until_ready(
        focal_loss(logits, targets, pos_weight, approx_reciprocal=False))
    assert jnp.allclose(out1, ref_pw, atol=1e-5, rtol=1e-4), (out1, ref_pw)

    # 2) pos_weight path, small tile -> multi-step accumulator; approx reciprocal
    #    (default, the v6e/v7x VALU win) -> slightly looser tolerance.
    out2 = jax.block_until_ready(focal_loss(logits, targets, pos_weight, tb=16))
    assert jnp.allclose(out2, ref_pw, atol=5e-3, rtol=5e-3), (out2, ref_pw)

    # 3) specialized no-pos_weight kernel variant.
    out3 = jax.block_until_ready(
        focal_loss(logits, targets, None, approx_reciprocal=False))
    assert jnp.allclose(out3, ref_nopw, atol=1e-5, rtol=1e-4), (out3, ref_nopw)

    # 4) ragged shapes: non-divisible B and L not a multiple of 128 -> padding path.
    B2, L2 = 50, 96
    lg2 = jax.random.normal(k1, (B2, L2), dtype=jnp.float32)
    tg2 = (jax.random.uniform(k2, (B2, L2)) > 0.5).astype(jnp.float32)
    pw2 = 0.5 + jax.random.uniform(k3, (L2,), dtype=jnp.float32)
    ref4 = focal_loss_ref(lg2, tg2, pw2)
    out4 = jax.block_until_ready(
        focal_loss(lg2, tg2.astype(jnp.bfloat16), pw2, approx_reciprocal=False))
    assert jnp.allclose(out4, ref4, atol=1e-5, rtol=1e-4), (out4, ref4)

    print("KERNEL_OK")
</pallas_src>

<mosaic_0001>
module attributes {stable_mosaic.version = 11 : i64} {
  func.func @kernel(%arg0: i32, %arg1: i32, %arg2: memref<32x128xf32, #tpu.memory_space<vmem>>, %arg3: memref<32x128xbf16, #tpu.memory_space<vmem>>, %arg4: memref<1x128xf32, #tpu.memory_space<vmem>>, %arg5: memref<1x1x128xf32, #tpu.memory_space<vmem>>) attributes {dimension_semantics = [#tpu.dimension_semantics<parallel>, #tpu.dimension_semantics<arbitrary>], iteration_bounds = array<i64: 2, 1>, scalar_prefetch = 0 : i64, scratch_operands = 0 : i64, tpu.core_type = #tpu.core_type<tc>, window_params = [{transform_indices = @transform_0, window_bounds = array<i64: 32, 128>}, {transform_indices = @transform_1, window_bounds = array<i64: 32, 128>}, {pipeline_mode = #tpu.pipeline_mode<synchronous>, transform_indices = @transform_2, window_bounds = array<i64: 1, 128>}, {transform_indices = @transform_3, window_bounds = array<i64: 1, 1, 128>}]} {
    %c0 = arith.constant 0 : index
    %c0_0 = arith.constant 0 : index
    %0 = vector.load %arg2[%c0, %c0_0] : memref<32x128xf32, #tpu.memory_space<vmem>>, vector<32x128xf32>
    %c0_1 = arith.constant 0 : index
    %c0_2 = arith.constant 0 : index
    %1 = vector.load %arg3[%c0_1, %c0_2] : memref<32x128xbf16, #tpu.memory_space<vmem>>, vector<32x128xbf16>
    %2 = arith.extf %1 : vector<32x128xbf16> to vector<32x128xf32>
    %3 = math.absf %0 : vector<32x128xf32>
    %cst = arith.constant 0.000000e+00 : f32
    %4 = vector.broadcast %cst : f32 to vector<32x128xf32>
    %5 = arith.subf %4, %3 : vector<32x128xf32>
    %6 = math.exp %5 : vector<32x128xf32>
    %cst_3 = arith.constant 0.000000e+00 : f32
    %7 = vector.broadcast %cst_3 : f32 to vector<32x128xf32>
    %8 = arith.subf %7, %0 : vector<32x128xf32>
    %cst_4 = arith.constant 0.000000e+00 : f32
    %9 = vector.broadcast %cst_4 : f32 to vector<32x128xf32>
    %10 = arith.maximumf %8, %9 : vector<32x128xf32>
    %11 = math.log1p %6 : vector<32x128xf32>
    %12 = arith.addf %10, %11 : vector<32x128xf32>
    %cst_5 = arith.constant 1.000000e+00 : f32
    %13 = vector.broadcast %cst_5 : f32 to vector<32x128xf32>
    %14 = arith.subf %13, %2 : vector<32x128xf32>
    %15 = arith.mulf %14, %0 : vector<32x128xf32>
    %c0_6 = arith.constant 0 : index
    %c0_7 = arith.constant 0 : index
    %16 = vector.load %arg4[%c0_6, %c0_7] : memref<1x128xf32, #tpu.memory_space<vmem>>, vector<1x128xf32>
    %17 = vector.broadcast %16 : vector<1x128xf32> to vector<32x128xf32>
    %18 = arith.mulf %17, %2 : vector<32x128xf32>
    %cst_8 = arith.constant 1.000000e+00 : f32
    %19 = vector.broadcast %cst_8 : f32 to vector<32x128xf32>
    %20 = arith.addf %19, %18 : vector<32x128xf32>
    %21 = arith.mulf %20, %12 : vector<32x128xf32>
    %22 = arith.addf %15, %21 : vector<32x128xf32>
    %cst_9 = arith.constant 1.000000e+00 : f32
    %23 = vector.broadcast %cst_9 : f32 to vector<32x128xf32>
    %24 = arith.addf %23, %6 : vector<32x128xf32>
    %cst_10 = arith.constant 1.000000e+00 : f32
    %25 = vector.broadcast %cst_10 : f32 to vector<32x128xf32>
    %26 = arith.divf %25, %24 : vector<32x128xf32>
    %cst_11 = arith.constant 0.000000e+00 : f32
    %27 = vector.broadcast %cst_11 : f32 to vector<32x128xf32>
    %28 = arith.cmpf oge, %0, %27 : vector<32x128xf32>
    %29 = arith.mulf %6, %26 : vector<32x128xf32>
    %30 = arith.select %28, %26, %29 : vector<32x128xi1>, vector<32x128xf32>
    %cst_12 = arith.constant 1.000000e+00 : f32
    %31 = vector.broadcast %cst_12 : f32 to vector<32x128xf32>
    %32 = arith.cmpf oeq, %2, %31 : vector<32x128xf32>
    %cst_13 = arith.constant 1.000000e+00 : f32
    %33 = vector.broadcast %cst_13 : f32 to vector<32x128xf32>
    %34 = arith.subf %33, %30 : vector<32x128xf32>
    %35 = arith.select %32, %34, %30 : vector<32x128xi1>, vector<32x128xf32>
    %36 = arith.mulf %35, %35 : vector<32x128xf32>
    %37 = arith.mulf %36, %22 : vector<32x128xf32>
    %38 = vector.shape_cast %37 : vector<32x128xf32> to vector<4x8x128xf32>
    %cst_14 = arith.constant dense<0.000000e+00> : vector<8x128xf32>
    %39 = vector.multi_reduction <add>, %38, %cst_14 [0] : vector<4x8x128xf32> to vector<8x128xf32>
    %cst_15 = arith.constant dense<0.000000e+00> : vector<128xf32>
    %40 = vector.multi_reduction <add>, %39, %cst_15 [0] : vector<8x128xf32> to vector<128xf32>
    %41 = vector.shape_cast %40 : vector<128xf32> to vector<1x1x128xf32>
    %c0_16 = arith.constant 0 : index
    %c0_17 = arith.constant 0 : index
    %c0_18 = arith.constant 0 : index
    %42 = vector.load %arg5[%c0_16, %c0_17, %c0_18] : memref<1x1x128xf32, #tpu.memory_space<vmem>>, vector<1x1x128xf32>
    tpu.vector_store %arg5[%c0_16, %c0_17, %c0_18], %41 {strides = array<i32>} : memref<1x1x128xf32, #tpu.memory_space<vmem>>, vector<1x1x128xf32>,
    return
  }
  func.func @transform_0(%arg0: i32, %arg1: i32) -> (i32, i32) {
    %c1_i32 = arith.constant 1 : i32
    %0 = arith.muli %arg0, %c1_i32 : i32
    %1 = arith.addi %0, %arg1 : i32
    %c0_i32 = arith.constant 0 : i32
    %c0_i32_0 = arith.constant 0 : i32
    return %1, %c0_i32 : i32, i32
  }
  func.func @transform_1(%arg0: i32, %arg1: i32) -> (i32, i32) {
    %c1_i32 = arith.constant 1 : i32
    %0 = arith.muli %arg0, %c1_i32 : i32
    %1 = arith.addi %0, %arg1 : i32
    %c0_i32 = arith.constant 0 : i32
    %c0_i32_0 = arith.constant 0 : i32
    return %1, %c0_i32 : i32, i32
  }
  func.func @transform_2(%arg0: i32, %arg1: i32) -> (i32, i32) {
    %c0_i32 = arith.constant 0 : i32
    %c0_i32_0 = arith.constant 0 : i32
    %c0_i32_1 = arith.constant 0 : i32
    return %c0_i32, %c0_i32_0 : i32, i32
  }
  func.func @transform_3(%arg0: i32, %arg1: i32) -> (i32, i32, i32) {
    %c0_i32 = arith.constant 0 : i32
    %c0_i32_0 = arith.constant 0 : i32
    %c0_i32_1 = arith.constant 0 : i32
    return %arg0, %c0_i32, %c0_i32_0 : i32, i32, i32
  }
}

</mosaic_0001>

<bundles_post_ra>
// kernel: tpu_custom_call.1
= control target key start
LH: loop header
LB: loop body
LE: loop exit
PB: predicated region body
PF: predicated region fallthrough
CT: control target
= control target key end

     0   :  { %s1093_s0 = inlined_call_operand.hbm [shape: f32[64,128], index: 0, kind: input, shape index: {}]   ;;  %s1094_s1 = inlined_call_operand.hbm [shape: bf16[64,128], index: 1, kind: input, shape index: {}]   ;;  %s1095_s2 = inlined_call_operand.vmem [shape: f32[1,128], index: 2, kind: input, shape index: {}]   ;;  %s1096_s3 = inlined_call_operand.hbm [shape: f32[2,1,128], index: 3, kind: output, shape index: {}]  }
   0x1   :  { %1097 = sst [smem:[#allocation11_spill]] %s1093_s0 }
   0x2   :  { %8 = vsyncpa [#allocation3], 0 }
   0x3   :  { %10 = vsyncpa [#allocation3 + $0x1], 0 }
   0x4   :  { %11 = vsyncpa [#allocation6], 0 }
   0x5   :  { %13 = vsyncpa [#allocation6 + $0x1], 0 }
   0x6   :  { %14 = vsyncpa [#allocation4], 0 }
   0x7   :  { %16 = vsyncpa [#allocation4 + $0x1], 0  ;;  %s812_s12 = smov 0   ;;  %s814_s13 = smov 0  }
   0x8   :  { %s816_s14 = smov 0   ;;  %s818_s15 = smov 0  }
   0x9   :  { %s820_s16 = smov 0   ;;  %s822_s17 = smov 0  }
   0xa LB: > { %s520_s18 = sadd.s32 4294967295, %s783_s17   ;;  %s521_s19 = sadd.s32 4294967294, %s783_s17   ;;  %s783_s17 = sphi %s822_s17, %s22_s17   ;;  %s779_s16 = sphi %s820_s16, %s1118_s16   ;;  %s775_s15 = sphi %s818_s15, %s1117_s15   ;;  %s771_s14 = sphi %s816_s14, %s1116_s14   ;;  %s767_s13 = sphi %s814_s13, %s1115_s13   ;;  %s763_s12 = sphi %s812_s12, %s1114_s12  }
   0xb   : > { %s34_s20 = sadd.s32 1, %s779_s16  ;;  %s43_s21 = sadd.s32 1, %s771_s14 }
   0xc   : > { %p36_p0 = scmp.ge.s32.totalorder %s34_s20, 2  ;;  %p50_p1 = scmp.ne.s32.totalorder %s771_s14, %s767_s13 }
   0xd   : > { %p51_p2 = scmp.eq.s32.totalorder %s783_s17, 0  ;;  %p56_p3 = scmp.ne.s32.totalorder %s767_s13, %s763_s12 }
   0xe   : > { %s1120_s20 = smov (%p36_p0, %s34_s20), 0  ;;  %p57_p5 = scmp.eq.s32.totalorder %s520_s18, 0 }
   0xf   : > { %p853_p4 = por %p51_p2, %p50_p1  ;;  %s40_s23 = ssub.s32 %s779_s16, %s1120_s20 }
  0x10   : > { %p129_p6 = scmp.eq.s32.totalorder %s520_s18, 1  ;;  %p41_p7 = scmp.eq.s32.totalorder %s40_s23, 0 }
  0x11   : > { %p859_p8 = por %p57_p5, %p56_p3  ;;  %p135_p10 = scmp.eq.s32.totalorder %s521_s19, 1 }
  0x12   : > { %p863_p9 = por %p129_p6, %p50_p1  ;;  %p565_p13 = scmp.lt.s32.totalorder %s783_s17, 2 }
  0x13   : > { %s868_s26 = scalar_select %p41_p7, %s771_s14, %s43_s21  }
  0x14   : > { %p870_p11 = por %p135_p10, %p56_p3  ;;  %s877_s28 = sand.u32 1, %s771_s14  }
  0x15   : > { %s524_s29 = sshll.u32 %s877_s28, 5  ;;  %s537_s30 = sshll.u32 %s779_s16, 9 }
  0x16   : > { %s1102_s0 = sld [smem:[#allocation11_spill]]  ;;  %s162_s7 = scalar_lea.vmem [#allocation2], %s524_s29 }
  0x17   : > { %s170_s8 = sshll.u32 %s162_s7, 4  ;;  %p886_p0 = pnand %p565_p13, %p853_p4  ;;  %s171_s8 = int_to_ptr.vmem [resolvable:$true] %s170_s8 }
  0x18   : > { %p530_p1 = scmp.ge.s32.totalorder %s783_s17, 1  ;;  %s159_s10 = scalar_lea.sflag [#allocation3], %s877_s28 }
  0x19   : > { %p645_p2 = pneg %p886_p0  ;;  %s656_s11 = scalar_lea.vmem %s171_s8, 512 }
  0x1a   : > { %p657_p3 = scmp.ne.s32.totalorder %s171_s8, %s656_s11  ;;  %s785_s18 = smov [#allocation2]  }
  0x1b   : > { %s661_s19 = sshll.u32 %s785_s18, 4  ;;  %s662_s19 = int_to_ptr.vmem [resolvable:$false] %s661_s19 }
  0x1c   : > { %s169_s6 = scalar_lea.hbm %s1102_s0, %s537_s30  ;;  %p659_p5 = pnand %p657_p3, %p645_p2 }
  0x1d   : > { %s663_s21 = scalar_lea.vmem %s662_s19, 1024  ;;  %p664_p4 = scmp.lt.s32.totalorder %s171_s8, %s662_s19 }
  0x1e   : > { %p660_p6 = pneg %p659_p5  ;;  %p665_p7 = scmp.lt.s32.totalorder %s663_s21, %s656_s11 }
  0x20   : > { %p666_p10 = por %p665_p7, %p664_p4 }
  0x22   : > { %p667_p13 = pnand %p666_p10, %p660_p6 }
  0x24   : > { %670 = shalt.err (!%p667_p13)
}
  0x25   : > { %s786_s22 = smov 128   ;;  %s787_s23 = smov 8  }
  0x26   : > { %557 = dma.hbm_to_vmem [thread:$0]  (!%p886_p0), %s169_s6, 512, %s171_s8, %s159_s10, %s786_s22, %s786_s22, %s787_s23  }
  0x27   : > { %p200_p3 = scmp.lt.s32.totalorder %s783_s17, 3  ;;  %s527_s29 = sshll.u32 %s877_s28, 4 }
  0x28   : > { %s538_s30 = sshll.u32 %s779_s16, 8  ;;  %s184_s18 = scalar_lea.vmem [#allocation5], %s527_s29 }
  0x29   : > { %p904_p5 = pnand %p530_p1, %p200_p3  ;;  %s191_s11 = scalar_lea.hbm %s1094_s1, %s538_s30 }
  0x2a   : > { %s192_s19 = sshll.u32 %s184_s18, 4  ;;  %s181_s21 = scalar_lea.sflag [#allocation6], %s877_s28  ;;  %s193_s19 = int_to_ptr.vmem [resolvable:$true] %s192_s19 }
  0x2b   : > { %s684_s0 = scalar_lea.vmem %s193_s19, 256  ;;  %s788_s6 = smov [#allocation5]  }
  0x2c   : > { %p685_p6 = scmp.ne.s32.totalorder %s193_s19, %s684_s0  ;;  %s689_s8 = sshll.u32 %s788_s6, 4  ;;  %s690_s8 = int_to_ptr.vmem [resolvable:$false] %s689_s8 }
  0x2d   : > { %s691_s10 = scalar_lea.vmem %s690_s8, 512  ;;  %p692_p1 = scmp.lt.s32.totalorder %s193_s19, %s690_s8 }
  0x2e   : > { %p687_p4 = pnand %p685_p6, %p645_p2  ;;  %p693_p10 = scmp.lt.s32.totalorder %s691_s10, %s684_s0 }
  0x30   : > { %p688_p7 = pneg %p687_p4  ;;  %p694_p13 = por %p693_p10, %p692_p1 }
  0x32   : > { %p695_p3 = pnand %p694_p13, %p688_p7 }
  0x34   : > { %698 = shalt.err (!%p695_p3)
}
  0x35   : > { %s789_s22 = smov 64   ;;  %s790_s23 = smov 4  }
  0x36   : > { %560 = dma.hbm_to_vmem [thread:$0]  (!%p886_p0), %s191_s11, 256, %s193_s19, %s181_s21, %s789_s22, %s789_s22, %s790_s23  }
  0x37   : > { %204 = sbr.rel (%p904_p5) target bundleno = 147 (0x93), region = 32  ;;  %s920_s28 = sand.u32 (!%p904_p5), 1, %s767_s13  }
  0x38   : > { %s531_s29 = sshll.u32 (!%p904_p5), %s920_s28, 5  ;;  %s207_s30 = scalar_lea.sflag (!%p904_p5), [#allocation3], %s920_s28 }
  0x39   : > { %s210_s0 = scalar_lea.vmem (!%p904_p5), [#allocation2], %s531_s29 }
  0x3c   : > { %750 = dma.done.wait (%p859_p8), %s207_s30, 512  }
  0x3d   : > { %752 = vsyncadd (%p859_p8), %s207_s30, 4294966784  ;;  %s532_s9 = sshll.u32 %s920_s28, 4  ;;  %s216_s4 = scalar_lea.sflag [#allocation6], %s920_s28 }
  0x3e   : > { %s930_s5 = scalar_lea.vmem [#allocation5], %s532_s9 }
  0x3f   : > { %754 = dma.done.wait (%p859_p8), %s216_s4, 256  }
  0x40   : > { %756 = vsyncadd (%p859_p8), %s216_s4, 4294967040  ;;  %v936_v0 = vld [vmem:[%s210_s0] sm:$0xff]  ;;  %v938_v1 = vld [vmem:[%s210_s0 + $0x8] sm:$0xff]  ;;  %s245_s11 = scalar_lea.vmem [#allocation7], %s920_s28  ;;  %s534_s19 = sshll.u32 %s775_s15, 4 }
  0x41   : > { %v940_v2 = vld [vmem:[%s210_s0 + $0x10] sm:$0xff]  ;;  %v942_v3 = vld [vmem:[%s210_s0 + $0x18] sm:$0xff]  ;;  %v262_v4 = vand.u32 2147483647, %v936_v0  ;;  %v263_v5 = vand.u32 2147483647, %v938_v1  ;;  %s422_s8 = scalar_lea.hbm %s1096_s3, %s534_s19 }
  0x42   : > { %v264_v6 = vand.u32 2147483647, %v940_v2  ;;  %v265_v7 = vand.u32 2147483647, %v942_v3  ;;  %v540_v22 = vld [vmem:[%s930_s5] sm:$0xff]   ;;  %v547_v24 = vld [vmem:[%s930_s5 + $0x8] sm:$0xff]  }
  0x43   : > { %v266_v8 = vsub.f32 0.0, %v262_v4  ;;  %v267_v9 = vsub.f32 0.0, %v263_v5  ;;  %v278_v25 = vsub.f32 0.0, %v936_v0  ;;  %v279_v26 = vsub.f32 0.0, %v938_v1  ;;  %v533_v40 = vld [vmem:[%s1095_s2] ss:$0 sm:$0xff] }
  0x44   : > { %v268_v10 = vsub.f32 0.0, %v264_v6  ;;  %v269_v11 = vsub.f32 0.0, %v265_v7  ;;  %v280_v27 = vsub.f32 0.0, %v940_v2  ;;  %v965_v29 = vunpack.c.l.bf16 %v540_v22  ;;  %s424_s18 = sshll.u32 %s245_s11, 4  ;;  %s412_s10 = scalar_lea.sflag [#allocation4], %s920_s28  ;;  %s425_s18 = int_to_ptr.vmem [resolvable:$true] %s424_s18 }
  0x45   : > { %v270_v12 = vmul.f32 1.442695, %v266_v8  ;;  %v272_v13 = vmul.f32 1.442695, %v267_v9  ;;  %v967_v30 = vunpack.c.h.bf16 %v540_v22  ;;  %v969_v31 = vunpack.c.l.bf16 %v547_v24  ;;  %s699_s22 = scalar_lea.vmem %s425_s18, 16  ;;  %s791_s23 = smov [#allocation7]  }
  0x46   : > { %v274_v14 = vmul.f32 1.442695, %v268_v10  ;;  %v276_v15 = vmul.f32 1.442695, %v269_v11  ;;  %v971_v32 = vunpack.c.h.bf16 %v547_v24  ;;  %v281_v34 = vsub.f32 0.0, %v942_v3  ;;  %p700_p8 = scmp.ne.s32.totalorder %s425_s18, %s699_s22  ;;  %s703_s29 = sshll.u32 %s791_s23, 4  ;;  %s704_s29 = int_to_ptr.vmem [resolvable:$false] %s703_s29 }
  0x47   : > { %619 = vpow2.f32 %v270_v12  ;;  %v282_v35 = vmax.f32 %v278_v25, 0.0  ;;  %v283_v37 = vmax.f32 %v279_v26, 0.0  ;;  %v284_v38 = vmax.f32 %v280_v27, 0.0  ;;  %s705_s30 = scalar_lea.vmem %s704_s29, 32  ;;  %p706_p5 = scmp.lt.s32.totalorder %s425_s18, %s704_s29 }
  0x48   : > { %621 = vpow2.f32 %v272_v13  ;;  %v326_v41 = vsub.f32 1.0, %v965_v29  ;;  %v327_v42 = vsub.f32 1.0, %v967_v30  ;;  %v328_v43 = vsub.f32 1.0, %v969_v31  ;;  %p701_p0 = pnand %p700_p8, %p863_p9  ;;  %p707_p6 = scmp.lt.s32.totalorder %s705_s30, %s699_s22 }
  0x49   : > { %623 = vpow2.f32 %v274_v14  ;;  %v329_v46 = vsub.f32 1.0, %v971_v32  ;;  %v285_v47 = vmax.f32 %v281_v34, 0.0  ;;  %v341_v50 = vmul.f32 %v965_v29, %v533_v40 }
  0x4a   : > { %625 = vpow2.f32 %v276_v15  ;;  %v342_v53 = vmul.f32 %v967_v30, %v533_v40  ;;  %v343_v54 = vmul.f32 %v969_v31, %v533_v40  ;;  %v330_v56 = vmul.f32 %v326_v41, %v936_v0  ;;  %p702_p2 = pneg %p701_p0  ;;  %p708_p4 = por %p707_p6, %p706_p5 }
  0x4b   : > { %v331_v57 = vmul.f32 %v327_v42, %v938_v1  ;;  %v332_v58 = vmul.f32 %v328_v43, %v940_v2  ;;  %v996_v61 = vmul.f32 %v329_v46, %v942_v3  ;;  %v344_v62 = vmul.f32 %v971_v32, %v533_v40 }
  0x4c   : > { %v345_v7 = vadd.f32 1.0, %v341_v50  ;;  %v346_v12 = vadd.f32 1.0, %v342_v53  ;;  %vm369_vm3 = vcmp.ge.f32.partialorder %v936_v0, 0.0  ;;  %vm370_vm4 = vcmp.ge.f32.partialorder %v938_v1, 0.0  ;;  %p709_p7 = pnand %p708_p4, %p702_p2 }
  0x4d   : > { %vm371_vm6 = vcmp.ge.f32.partialorder %v940_v2, 0.0  ;;  %vm372_vm7 = vcmp.ge.f32.partialorder %v942_v3, 0.0  ;;  %vm381_vm8 = vcmp.eq.f32.partialorder %v965_v29, 1.0  ;;  %vm382_vm9 = vcmp.eq.f32.partialorder %v967_v30, 1.0 }
  0x4e   : > { %vm383_vm10 = vcmp.eq.f32.partialorder %v969_v31, 1.0  ;;  %vm384_vm11 = vcmp.eq.f32.partialorder %v971_v32, 1.0 }
  0x54   : > { %v948_v16 = vpop.eup %619 }
  0x55   : > { %v950_v17 = vpop.eup %621  ;;  %v286_v18 = vadd.f32 1.0, %v948_v16  ;;  %v289_v33 = vmul.f32 -0.5, %v948_v16  ;;  %v292_v48 = vand.u32 2147483647, %v948_v16 }
  0x56   : > { %v953_v19 = vpop.eup %623  ;;  %v295_v20 = vadd.f32 1.0, %v950_v17  ;;  %v298_v36 = vmul.f32 -0.5, %v950_v17  ;;  %v301_v51 = vand.u32 2147483647, %v950_v17 }
  0x57   : > { %v956_v21 = vpop.eup %625  ;;  %627 = vlog2.f32 %v286_v18  ;;  %v304_v23 = vadd.f32 1.0, %v953_v19  ;;  %v307_v39 = vmul.f32 -0.5, %v953_v19  ;;  %v290_v44 = vadd.f32 1.0, %v289_v33 }
  0x58   : > { %629 = vlog2.f32 %v295_v20  ;;  %v313_v28 = vadd.f32 1.0, %v956_v21  ;;  %v316_v45 = vmul.f32 -0.5, %v956_v21  ;;  %v299_v49 = vadd.f32 1.0, %v298_v36 }
  0x59   : > { %631 = vlog2.f32 %v304_v23  ;;  %v308_v52 = vadd.f32 1.0, %v307_v39  ;;  %v310_v55 = vand.u32 2147483647, %v953_v19  ;;  %v291_v59 = vmul.f32 %v948_v16, %v290_v44 }
  0x5a   : > { %633 = vlog2.f32 %v313_v28  ;;  %v317_v60 = vadd.f32 1.0, %v316_v45  ;;  %vm999_vm0 = vcmp.lt.f32.partialorder %v292_v48, 0.0004427343  ;;  %v300_v5 = vmul.f32 %v950_v17, %v299_v49 }
  0x5b   : > { %635 = vrcp.f32 %v286_v18  ;;  %v319_v6 = vand.u32 2147483647, %v956_v21  ;;  %vm1005_vm1 = vcmp.lt.f32.partialorder %v301_v51, 0.0004427343  ;;  %v309_v11 = vmul.f32 %v953_v19, %v308_v52 }
  0x5c   : > { %637 = vrcp.f32 %v295_v20  ;;  %vm1010_vm2 = vcmp.lt.f32.partialorder %v310_v55, 0.0004427343  ;;  %v347_v18 = vadd.f32 1.0, %v343_v54 }
  0x5d   : > { %639 = vrcp.f32 %v304_v23  ;;  %v318_v23 = vmul.f32 %v956_v21, %v317_v60  ;;  %vm1021_vm5 = vcmp.lt.f32.partialorder %v319_v6, 0.0004427343 }
  0x5e   : > { %641 = vrcp.f32 %v313_v28  ;;  %v348_v28 = vadd.f32 1.0, %v344_v62 }
  0x64   : > { %v628_v63 = vpop.eup %627 }
  0x65   : > { %v630_v8 = vpop.eup %629  ;;  %v288_v9 = vmul.f32 0.6931472, %v628_v63 }
  0x66   : > { %v632_v13 = vpop.eup %631  ;;  %v297_v14 = vmul.f32 0.6931472, %v630_v8 }
  0x67   : > { %v294_v20 = vsel %vm999_vm0, %v291_v59, %v288_v9  ;;  %v306_v22 = vmul.f32 0.6931472, %v632_v13  ;;  %v634_v24 = vpop.eup %633 }
  0x68   : > { %v303_v25 = vsel %vm1005_vm1, %v300_v5, %v297_v14  ;;  %v322_v27 = vadd.f32 %v294_v20, %v282_v35  ;;  %v636_v33 = vpop.eup %635  ;;  %v315_v36 = vmul.f32 0.6931472, %v634_v24 }
  0x69   : > { %v312_v34 = vsel %vm1010_vm2, %v309_v11, %v306_v22  ;;  %v323_v39 = vadd.f32 %v303_v25, %v283_v37  ;;  %v638_v40 = vpop.eup %637  ;;  %v373_v42 = vmul.f32 %v636_v33, %v948_v16 }
  0x6a   : > { %v324_v41 = vadd.f32 %v312_v34, %v284_v38  ;;  %v640_v43 = vpop.eup %639  ;;  %v321_v35 = vsel %vm1021_vm5, %v318_v23, %v315_v36  ;;  %v349_v44 = vmul.f32 %v345_v7, %v322_v27  ;;  %v374_v45 = vmul.f32 %v638_v40, %v950_v17 }
  0x6b   : > { %v642_v37 = vpop.eup %641  ;;  %v325_v46 = vadd.f32 %v321_v35, %v285_v47  ;;  %v350_v48 = vmul.f32 %v346_v12, %v323_v39  ;;  %v375_v38 = vmul.f32 %v640_v43, %v953_v19  ;;  %v377_v16 = vsel %vm369_vm3, %v636_v33, %v373_v42 }
  0x6c   : > { %v351_v49 = vmul.f32 %v347_v18, %v324_v41  ;;  %v376_v50 = vmul.f32 %v642_v37, %v956_v21  ;;  %v378_v51 = vsel %vm370_vm4, %v638_v40, %v374_v45  ;;  %v385_v47 = vsub.f32 1.0, %v377_v16 }
  0x6d   : > { %v352_v52 = vmul.f32 %v348_v28, %v325_v46  ;;  %v379_v17 = vsel %vm371_vm6, %v640_v43, %v375_v38  ;;  %v353_v53 = vadd.f32 %v349_v44, %v330_v56  ;;  %v386_v21 = vsub.f32 1.0, %v378_v51 }
  0x6e   : > { %v380_v19 = vsel %vm372_vm7, %v642_v37, %v376_v50  ;;  %v387_v54 = vsub.f32 1.0, %v379_v17  ;;  %v354_v0 = vadd.f32 %v350_v48, %v331_v57  ;;  %v355_v55 = vadd.f32 %v351_v49, %v332_v58 }
  0x6f   : > { %v388_v59 = vsub.f32 1.0, %v380_v19  ;;  %v389_v1 = vsel %vm381_vm8, %v385_v47, %v377_v16  ;;  %v390_v31 = vsel %vm382_vm9, %v386_v21, %v378_v51  ;;  %v356_v32 = vadd.f32 %v352_v52, %v996_v61 }
  0x70   : > { %v391_v2 = vsel %vm383_vm10, %v387_v54, %v379_v17  ;;  %v393_v60 = vmul.f32 %v389_v1, %v389_v1  ;;  %v394_v62 = vmul.f32 %v390_v31, %v390_v31 }
  0x71   : > { %v392_v56 = vsel %vm384_vm11, %v388_v59, %v380_v19  ;;  %v395_v3 = vmul.f32 %v391_v2, %v391_v2 }
  0x72   : > { %v396_v63 = vmul.f32 %v392_v56, %v392_v56  ;;  %v397_v4 = vmul.f32 %v393_v60, %v353_v53  ;;  %v398_v57 = vmul.f32 %v394_v62, %v354_v0 }
  0x73   : > { %v399_v58 = vmul.f32 %v395_v3, %v355_v55 }
  0x74   : > { %v400_v5 = vmul.f32 %v396_v63, %v356_v32  ;;  %v401_v29 = vadd.f32 %v398_v57, %v397_v4 }
  0x76   : > { %v402_v6 = vadd.f32 %v401_v29, %v399_v58 }
  0x78   : > { %v403_v7 = vadd.f32 %v402_v6, %v400_v5 }
  0x7a   : > { %v404_v30 = vrot.slane %v403_v7, 4 }
  0x7c   : > { %v405_v8 = vadd.f32 %v404_v30, %v403_v7 }
  0x7e   : > { %v406_v9 = vrot.slane %v405_v8, 2 }
  0x80   : > { %v407_v10 = vadd.f32 %v406_v9, %v405_v8 }
  0x82   : > { %v408_v61 = vrot.slane %v407_v10, 1 }
  0x84   : > { %v409_v11 = vadd.f32 %v408_v61, %v407_v10 }
  0x86   : > { %410 = vst [vmem:[%s245_s11] sm:$0x1] %v409_v11 }
  0x87   : > { %712 = shalt.err (!%p709_p7)
}
  0x88   : > { %s713_s15 = scalar_lea.hbm %s422_s8, 16  ;;  %s717_s9 = scalar_lea.hbm %s1096_s3, 32 }
  0x89   : > { %p714_p1 = scmp.ne.s32.totalorder %s422_s8, %s713_s15  ;;  %p718_p3 = scmp.lt.s32.totalorder %s422_s8, %s1096_s3 }
  0x8a   : > { %p719_p8 = scmp.lt.s32.totalorder %s717_s9, %s713_s15 }
  0x8b   : > { %p715_p10 = pnand %p714_p1, %p863_p9 }
  0x8c   : > { %p720_p0 = por %p719_p8, %p718_p3 }
  0x8d   : > { %p716_p13 = pneg %p715_p10 }
  0x8f   : > { %p721_p12 = pnand %p720_p0, %p716_p13 }
  0x91   : > { %724 = shalt.err (!%p721_p12)
}
  0x92   : > { %552 = dma.vmem_to_hbm [thread:$0]  (%p863_p9), %s425_s18, 16, %s422_s8, %s412_s10  }
  0x93 PF: > { %s436_s24 = sand.u32 1, %s763_s12   ;;  %p1113_p2 = scmp.ge.s32.totalorder %s783_s17, 2 }
  0x94   : > { %s437_s7 = scalar_lea.sflag [#allocation4], %s436_s24 }
  0x95   : > { %p562_p5 = pnand %p1113_p2, %p870_p11 }
  0x97   : > { %p563_p6 = pneg %p562_p5 }
  0x99   : > { %758 = dma.done.wait (%p563_p6), %s437_s7, 16  }
  0x9a   : > { %760 = vsyncadd (%p563_p6), %s437_s7, 4294967280  ;;  %s22_s17 = sadd.s32 1, %s783_s17   ;;  %s1114_s12 = smov %s767_s13 }
  0x9b   : > { %p19_p4 = scmp.ge.s32.totalorder %s22_s17, 4   ;;  %s1115_s13 = smov %s771_s14 }
  0x9c   : > { %s1116_s14 = smov %s868_s26  ;;  %s1117_s15 = smov %s779_s16 }
  0x9d   : > { %s1118_s16 = smov %s1120_s20  ;;  %21 = sbr.rel (!%p19_p4) target bundleno = 10 (0xa), region = 90 }
  0xa2   :  { %441 = vsyncpa [#allocation3], 1 }
  0xa3   :  { %443 = vsyncpa [#allocation3 + $0x1], 1 }
  0xa4   :  { %444 = vsyncpa [#allocation6], 1 }
  0xa5   :  { %446 = vsyncpa [#allocation6 + $0x1], 1 }
  0xa6   :  { %447 = vsyncpa [#allocation4], 1 }
  0xa7   :  { %449 = vsyncpa [#allocation4 + $0x1], 1 }

</bundles_post_ra>
